<compile_context>
chip_gen: v7x
topology: tpu7x:2x2x1
jax: 0.10.0
libtpu: 0.0.40
codegen_flags: <defaults>
</compile_context>

<pallas_src>
import math

import jax
import jax.numpy as jnp
from jax.experimental import pallas as pl
from jax.experimental.pallas import tpu as pltpu


def _copy_kernel(x_ref, o_ref):
    # HBM-bound memcpy; anything fancier in the body cannot help (review item:
    # keep o_ref[...] = x_ref[...], no extra buffering / vreg tricks).
    o_ref[...] = x_ref[...]


_SMALL_BYTES = 4 * 1024 * 1024       # single-block, no-grid path threshold
_BLOCK_BYTES = 4 * 1024 * 1024       # per-block budget on the tiled path
_LANE_CAP = 8192                     # max lane width of the copy layout
_VMEM_LIMIT = 48 * 1024 * 1024       # safe on v7x (64 MiB phys), ample on v5e/v6e


def _lane_width(total):
    """Largest multiple of 128 dividing `total`, capped at _LANE_CAP (0 if none)."""
    cand = (min(total, _LANE_CAP) // 128) * 128
    while cand > 0:
        if total % cand == 0:
            return cand
        cand -= 128
    return 0


def _copy_2d(x2d, rows, cols, block_rows):
    """Tiled lane-dense copy of a (rows, cols) array, block_rows rows per step."""
    nbytes = rows * cols * jnp.dtype(x2d.dtype).itemsize
    return pl.pallas_call(
        _copy_kernel,
        out_shape=jax.ShapeDtypeStruct((rows, cols), x2d.dtype),
        grid=(pl.cdiv(rows, block_rows),),
        in_specs=[pl.BlockSpec((block_rows, cols), lambda i: (i, 0))],
        out_specs=pl.BlockSpec((block_rows, cols), lambda i: (i, 0)),
        cost_estimate=pl.CostEstimate(
            flops=0, transcendentals=0, bytes_accessed=2 * nbytes),
        compiler_params=pltpu.CompilerParams(
            dimension_semantics=("parallel",),
            vmem_limit_bytes=_VMEM_LIMIT,
        ),
    )(x2d)


def flatten_pallas(x, copy=True):
    """Equivalent of Flatten.forward: x.view(-1, prod(x.shape[1:])).

    copy=False: pure metadata reshape (zero HBM traffic) — preferred when the
    caller does not need a freshly materialized buffer.
    copy=True:  materialize the flattened result with a Pallas memcpy kernel.
    """
    b = x.shape[0] if x.ndim >= 1 else 1
    feat = math.prod(x.shape[1:]) if x.ndim > 1 else 1

    # Row-major flatten of trailing dims (torch contiguous .view semantics).
    x2d = jnp.reshape(x, (b, feat))

    if not copy:
        return x2d

    itemsize = jnp.dtype(x.dtype).itemsize
    total = b * feat
    nbytes = total * itemsize

    if nbytes <= _SMALL_BYTES:
        # Whole array as one block: no grid, full-dim block (always legal),
        # in + out <= 8 MiB so well under any scoped-VMEM default.
        return pl.pallas_call(
            _copy_kernel,
            out_shape=jax.ShapeDtypeStruct((b, feat), x.dtype),
            in_specs=[pl.BlockSpec((b, feat), lambda: (0, 0))],
            out_specs=pl.BlockSpec((b, feat), lambda: (0, 0)),
            cost_estimate=pl.CostEstimate(
                flops=0, transcendentals=0, bytes_accessed=2 * nbytes),
            compiler_params=pltpu.CompilerParams(vmem_limit_bytes=_VMEM_LIMIT),
        )(x2d)

    # Large path: pick a lane-dense copy layout independent of (b, feat).
    lanes = _lane_width(total)
    if lanes:
        rows = total // lanes
        pack = max(8, 32 // itemsize)  # sublane packing: 8 f32, 16 bf16, 32 int8
        block_rows = max(1, _BLOCK_BYTES // (lanes * itemsize))
        if block_rows >= pack:
            block_rows = (block_rows // pack) * pack
        block_rows = min(block_rows, rows)
        y = _copy_2d(jnp.reshape(x2d, (rows, lanes)), rows, lanes, block_rows)
        return jnp.reshape(y, (b, feat))

    # total not divisible by 128: full-feature-row blocks (correct; stores may
    # be masked, but no VMEM blow-up since block bytes stay bounded).
    row_bytes = feat * itemsize
    if row_bytes <= 3 * _BLOCK_BYTES:
        block_rows = min(b, max(1, _BLOCK_BYTES // row_bytes))
        return _copy_2d(x2d, b, feat, block_rows)

    # Pathological shape (huge 128-indivisible feature rows): flatten needs no
    # data movement anyway, so return the metadata reshape instead of a kernel
    # that would exceed the per-block VMEM budget.
    return x2d


if __name__ == "__main__":
    key = jax.random.PRNGKey(0)

    # Small NCHW input consistent with an image-classification feature map.
    x = jax.random.normal(key, (2, 4, 16, 16), dtype=jnp.float32)
    y = flatten_pallas(x)            # exercises the single-block path
    jax.block_until_ready(y)
    y_ref = jnp.reshape(x, (x.shape[0], -1))
    assert y.shape == (2, 4 * 16 * 16), y.shape
    assert y.dtype == x.dtype
    assert bool(jnp.all(y == y_ref))

    # Also exercise the tiled lane-dense path (8 MiB input, deterministic).
    x_big = jnp.arange(8 * 16 * 64 * 256, dtype=jnp.float32).reshape(8, 16, 64, 256)
    y_big = flatten_pallas(x_big)
    jax.block_until_ready(y_big)
    assert y_big.shape == (8, 16 * 64 * 256), y_big.shape
    assert bool(jnp.all(y_big == jnp.reshape(x_big, (8, -1))))

    # copy=False path: pure metadata reshape, no kernel.
    y_view = flatten_pallas(x, copy=False)
    assert bool(jnp.all(y_view == y_ref))

    print("KERNEL_OK")
</pallas_src>

<mosaic_0001>
module attributes {stable_mosaic.version = 11 : i64} {
  func.func @_copy_kernel(%arg0: memref<2x1024xf32, #tpu.memory_space<vmem>>, %arg1: memref<2x1024xf32, #tpu.memory_space<vmem>>) attributes {dimension_semantics = [], scalar_prefetch = 0 : i64, scratch_operands = 0 : i64, tpu.core_type = #tpu.core_type<tc>} {
    %c0 = arith.constant 0 : index
    %c0_0 = arith.constant 0 : index
    %0 = vector.load %arg0[%c0, %c0_0] : memref<2x1024xf32, #tpu.memory_space<vmem>>, vector<2x1024xf32>
    %c0_1 = arith.constant 0 : index
    %c0_2 = arith.constant 0 : index
    %1 = vector.load %arg1[%c0_1, %c0_2] : memref<2x1024xf32, #tpu.memory_space<vmem>>, vector<2x1024xf32>
    tpu.vector_store %arg1[%c0_1, %c0_2], %0 {strides = array<i32>} : memref<2x1024xf32, #tpu.memory_space<vmem>>, vector<2x1024xf32>,
    return
  }
}

</mosaic_0001>

<bundles_post_ra>
// kernel: tpu_custom_call.1
= control target key start
LH: loop header
LB: loop body
LE: loop exit
PB: predicated region body
PF: predicated region fallthrough
CT: control target
= control target key end

     0   :  { %6 = vsyncpa [#allocation3], 0  ;;  %s126_s0 = inlined_call_operand.hbm [shape: f32[2,1024], index: 0, kind: input, shape index: {}]   ;;  %s127_s1 = inlined_call_operand.hbm [shape: f32[2,1024], index: 1, kind: output, shape index: {}]  }
   0x1   :  { %7 = vsyncpa [#allocation4], 0  ;;  %s90_s6 = smov [#allocation2]   ;;  %s42_s10 = scalar_lea.hbm %s126_s0, 256 }
   0x2   :  { %s14_s7 = sshll.u32 %s90_s6, 4  ;;  %p43_p0 = scmp.ne.s32.totalorder %s126_s0, %s42_s10  ;;  %s15_s7 = int_to_ptr.vmem [resolvable:$true] %s14_s7 }
   0x3   :  { %p46_p1 = scmp.lt.u32.totalorder %s42_s10, %s126_s0 }
   0x5   :  { %p48_p2 = pnand %p46_p1, %p43_p0 }
   0x7   :  { %51 = shalt.err (!%p48_p2)
}
   0x8   :  { %s52_s15 = scalar_lea.vmem %s15_s7, 256  ;;  %p57_p4 = scmp.lt.s32.totalorder %s15_s7, %s15_s7 }
   0x9   :  { %p53_p3 = scmp.ne.s32.totalorder %s15_s7, %s52_s15  ;;  %p58_p5 = scmp.lt.s32.totalorder %s52_s15, %s52_s15 }
   0xb   :  { %p59_p6 = por %p58_p5, %p57_p4 }
   0xd   :  { %p60_p7 = pnand %p59_p6, %p53_p3 }
   0xf   :  { %63 = shalt.err (!%p60_p7)
}
  0x10   :  { %17 = dma.hbm_to_vmem [thread:$0]  %s126_s0, 256, %s15_s7, [#allocation3]  }
  0x11   :  { %86 = dma.done.wait [#allocation3], 256  }
  0x12   :  { %87 = vsyncadd [#allocation3], 4294967040  ;;  %s91_s18 = smov [#allocation5]   ;;  %v21_v0 = vld [vmem:[#allocation2] sm:$0xff]  ;;  %v22_v1 = vld [vmem:[#allocation2 + $0x8] sm:$0xff] }
  0x13   :  { %s31_s19 = sshll.u32 %s91_s18, 4  ;;  %23 = vst [vmem:[#allocation5] sm:$0xff] %v21_v0  ;;  %24 = vst [vmem:[#allocation5 + $0x8] sm:$0xff] %v22_v1  ;;  %s32_s19 = int_to_ptr.vmem [resolvable:$true] %s31_s19 }
  0x14   :  { %s64_s20 = scalar_lea.vmem %s32_s19, 256  ;;  %p69_p9 = scmp.lt.s32.totalorder %s32_s19, %s32_s19 }
  0x15   :  { %p65_p8 = scmp.ne.s32.totalorder %s32_s19, %s64_s20  ;;  %p70_p10 = scmp.lt.s32.totalorder %s64_s20, %s64_s20 }
  0x17   :  { %p71_p11 = por %p70_p10, %p69_p9 }
  0x19   :  { %p72_p12 = pnand %p71_p11, %p65_p8 }
  0x1b   :  { %75 = shalt.err (!%p72_p12)
}
  0x1c   :  { %s76_s0 = scalar_lea.hbm %s127_s1, 256 }
  0x1d   :  { %p77_p13 = scmp.ne.s32.totalorder %s127_s1, %s76_s0  ;;  %p80_p0 = scmp.lt.u32.totalorder %s76_s0, %s127_s1 }
  0x1f   :  { %p82_p1 = pnand %p80_p0, %p77_p13 }
  0x21   :  { %85 = shalt.err (!%p82_p1)
}
  0x22   :  { %34 = dma.vmem_to_hbm [thread:$0]  %s32_s19, 256, %s127_s1, [#allocation4]  }
  0x23   :  { %88 = dma.done.wait [#allocation4], 256  }
  0x24   :  { %89 = vsyncadd [#allocation4], 4294967040 }
  0x25   :  { %38 = vsyncpa [#allocation3], 1 }
  0x26   :  { %39 = vsyncpa [#allocation4], 1 }

</bundles_post_ra>
